<compile_context>
chip_gen: v7x
topology: tpu7x:2x2x1
jax: 0.10.0
libtpu: 0.0.40
codegen_flags: <defaults>
</compile_context>

<pallas_src>
import functools

import jax
import jax.numpy as jnp
from jax.experimental import pallas as pl
from jax.experimental.pallas import tpu as pltpu


# Portable scoped-VMEM budget: fine on v5e/v6e (128 MiB physical) and well
# under v7x's 64 MiB physical VMEM.
_VMEM_LIMIT = 32 * 1024 * 1024


def _round_up(x, m):
    return (x + m - 1) // m * m


# ----------------------------------------------------------------------------
# Fused matmul kernel: (M, K) @ (K, Cp) with BN scale/bias (+ optional residual
# add) (+ optional ReLU) epilogue.  K is the reduction grid axis ("arbitrary")
# accumulating into a VMEM f32 scratch; M is tiled and "parallel".
# ----------------------------------------------------------------------------
def _matmul_fused_kernel(*refs, relu, has_sc):
    if has_sc:
        x_ref, w_ref, s_ref, b_ref, sc_ref, o_ref, acc_ref = refs
    else:
        x_ref, w_ref, s_ref, b_ref, o_ref, acc_ref = refs
        sc_ref = None
    k = pl.program_id(1)

    @pl.when(k == 0)
    def _():
        acc_ref[...] = jnp.zeros_like(acc_ref)

    acc_ref[...] += jnp.dot(x_ref[...], w_ref[...],
                            preferred_element_type=jnp.float32)

    @pl.when(k == pl.num_programs(1) - 1)
    def _():
        acc = acc_ref[...] * s_ref[...] + b_ref[...]
        if sc_ref is not None:
            acc = acc + sc_ref[...]
        if relu:
            acc = jnp.maximum(acc, 0.0)
        o_ref[...] = acc


def matmul_bn_act(x, w, scale, bias, shortcut=None, relu=True):
    """x: (M, K); w: (K, Cout); scale/bias: (Cout,); shortcut: (M, Cout) f32."""
    M, K = x.shape
    Cout = w.shape[1]
    Cp = _round_up(Cout, 128)          # lane-dense (unmasked) stores
    Kp = _round_up(K, 128)             # lane-aligned reduction dim
    tm = min(512, _round_up(M, 16))    # row tile (bf16 sublane-friendly)
    Mp = _round_up(M, tm)
    if Kp % 512 == 0:
        tk = 512
    elif Kp % 256 == 0:
        tk = 256
    else:
        tk = 128

    # bf16 MXU inputs, f32 accumulate + epilogue.
    xb = jnp.pad(x.astype(jnp.bfloat16), ((0, Mp - M), (0, Kp - K)))
    wb = jnp.pad(w.astype(jnp.bfloat16), ((0, Kp - K), (0, Cp - Cout)))
    sp = jnp.pad(scale.reshape(1, Cout).astype(jnp.float32),
                 ((0, 0), (0, Cp - Cout)))
    bp = jnp.pad(bias.reshape(1, Cout).astype(jnp.float32),
                 ((0, 0), (0, Cp - Cout)))

    args = [xb, wb, sp, bp]
    in_specs = [
        pl.BlockSpec((tm, tk), lambda i, k: (i, k)),
        pl.BlockSpec((tk, Cp), lambda i, k: (k, 0)),
        pl.BlockSpec((1, Cp), lambda i, k: (0, 0)),
        pl.BlockSpec((1, Cp), lambda i, k: (0, 0)),
    ]
    has_sc = shortcut is not None
    io_alias = {}
    if has_sc:
        scp = jnp.pad(shortcut.astype(jnp.float32),
                      ((0, Mp - M), (0, Cp - Cout)))
        args.append(scp)
        in_specs.append(pl.BlockSpec((tm, Cp), lambda i, k: (i, 0)))
        io_alias = {4: 0}  # write fused result over the shortcut buffer

    out = pl.pallas_call(
        functools.partial(_matmul_fused_kernel, relu=relu, has_sc=has_sc),
        out_shape=jax.ShapeDtypeStruct((Mp, Cp), jnp.float32),
        grid=(Mp // tm, Kp // tk),
        in_specs=in_specs,
        out_specs=pl.BlockSpec((tm, Cp), lambda i, k: (i, 0)),
        scratch_shapes=[pltpu.VMEM((tm, Cp), jnp.float32)],
        input_output_aliases=io_alias,
        compiler_params=pltpu.CompilerParams(
            dimension_semantics=("parallel", "arbitrary"),
            vmem_limit_bytes=_VMEM_LIMIT),
    )(*args)
    return out[:M, :Cout]


# ----------------------------------------------------------------------------
# Conv = im2col (layout glue) + tiled Pallas matmul kernel
# ----------------------------------------------------------------------------
def conv2d_bn_act(x, w, scale, bias, stride, padding, relu, shortcut=None):
    """x: (N,H,W,Cin) NHWC, w: (KH,KW,Cin,Cout). Returns (N,Ho,Wo,Cout)."""
    N, H, W, Cin = x.shape
    KH, KW, _, Cout = w.shape
    Ho = (H + 2 * padding - KH) // stride + 1
    Wo = (W + 2 * padding - KW) // stride + 1
    xp = jnp.pad(x, ((0, 0), (padding, padding), (padding, padding), (0, 0))) \
        if padding else x
    # TODO(synk): im2col still duplicates activations KH*KW x in HBM; a true
    # tap-as-grid-reduction needs strided/overlapping BlockSpecs Pallas can't
    # express, so K is at least kept 128-lane padded inside matmul_bn_act.
    pats = []
    for kh in range(KH):
        for kw in range(KW):
            pats.append(xp[:, kh:kh + stride * Ho:stride,
                           kw:kw + stride * Wo:stride, :])
    X = jnp.concatenate(pats, axis=-1).reshape(N * Ho * Wo, KH * KW * Cin)
    Wm = w.reshape(KH * KW * Cin, Cout)
    out = matmul_bn_act(X, Wm, scale, bias, shortcut=shortcut, relu=relu)
    return out.reshape(N, Ho, Wo, Cout)


# ----------------------------------------------------------------------------
# MaxPool2d(3, stride=2, pad=1) fused with alpha*pooled + beta*motion.
# Reads the padded activation directly (9 strided taps in-kernel), no (9,M,C)
# patch stack materialized in HBM.
# ----------------------------------------------------------------------------
def _maxpool_fuse_kernel(xp_ref, m_ref, o_ref, *, alpha, beta, ho, wo):
    pooled = None
    for kh in range(3):
        for kw in range(3):
            tap = xp_ref[:, pl.ds(kh, ho, 2), pl.ds(kw, wo, 2), :]
            pooled = tap if pooled is None else jnp.maximum(pooled, tap)
    o_ref[...] = alpha * pooled + beta * m_ref[...]


def maxpool3x3s2p1_fuse(x, motion, alpha, beta):
    N, H, W, C = x.shape
    Ho = (H + 2 - 3) // 2 + 1
    Wo = (W + 2 - 3) // 2 + 1
    assert motion.shape == (N, Ho, Wo, C), (motion.shape, (N, Ho, Wo, C))
    xp = jnp.pad(x, ((0, 0), (1, 1), (1, 1), (0, 0)),
                 constant_values=-jnp.inf)   # maxpool padding is -inf
    Hp, Wp = H + 2, W + 2
    return pl.pallas_call(
        functools.partial(_maxpool_fuse_kernel, alpha=alpha, beta=beta,
                          ho=Ho, wo=Wo),
        out_shape=jax.ShapeDtypeStruct((N, Ho, Wo, C), jnp.float32),
        grid=(N,),
        in_specs=[
            pl.BlockSpec((1, Hp, Wp, C), lambda n: (n, 0, 0, 0)),
            pl.BlockSpec((1, Ho, Wo, C), lambda n: (n, 0, 0, 0)),
        ],
        out_specs=pl.BlockSpec((1, Ho, Wo, C), lambda n: (n, 0, 0, 0)),
        compiler_params=pltpu.CompilerParams(
            dimension_semantics=("parallel",),
            vmem_limit_bytes=_VMEM_LIMIT),
    )(xp, motion)


# ----------------------------------------------------------------------------
# Global average pool + FC (lane-dense padded output)
# ----------------------------------------------------------------------------
def _avgpool_fc_kernel(x_ref, w_ref, b_ref, o_ref, *, inv_hw):
    pooled = jnp.sum(x_ref[...], axis=1) * inv_hw          # (N, C)
    o_ref[...] = jnp.dot(pooled, w_ref[...],
                         preferred_element_type=jnp.float32) + b_ref[...]


def avgpool_fc(x_nhwc, w, b):
    N, H, W, C = x_nhwc.shape
    nc = w.shape[1]
    ncp = _round_up(nc, 128)
    xf = x_nhwc.reshape(N, H * W, C)
    wp = jnp.pad(w.astype(jnp.float32), ((0, 0), (0, ncp - nc)))
    bp = jnp.pad(b.reshape(1, nc).astype(jnp.float32), ((0, 0), (0, ncp - nc)))
    out = pl.pallas_call(
        functools.partial(_avgpool_fc_kernel, inv_hw=1.0 / (H * W)),
        out_shape=jax.ShapeDtypeStruct((N, ncp), jnp.float32),
        grid=(1,),
        in_specs=[
            pl.BlockSpec((N, H * W, C), lambda i: (0, 0, 0)),
            pl.BlockSpec((C, ncp), lambda i: (0, 0)),
            pl.BlockSpec((1, ncp), lambda i: (0, 0)),
        ],
        out_specs=pl.BlockSpec((N, ncp), lambda i: (0, 0)),
        compiler_params=pltpu.CompilerParams(vmem_limit_bytes=_VMEM_LIMIT),
    )(xf, wp, bp)
    return out[:, :nc]


# ----------------------------------------------------------------------------
# Synthetic backbone parameters (deterministic init) and forward glue
# ----------------------------------------------------------------------------
def fold_bn(gamma, beta, mean, var, eps=1e-5):
    s = gamma / jnp.sqrt(var + eps)
    return s, beta - mean * s


def init_params(key, base=8, num_classes=10):
    keys = iter(jax.random.split(key, 64))

    def conv(kh, kw, cin, cout):
        return 0.1 * jax.random.normal(next(keys), (kh, kw, cin, cout), jnp.float32)

    def bn(c):
        g = 1.0 + 0.05 * jax.random.normal(next(keys), (c,), jnp.float32)
        b = 0.05 * jax.random.normal(next(keys), (c,), jnp.float32)
        m = 0.05 * jax.random.normal(next(keys), (c,), jnp.float32)
        v = 1.0 + 0.1 * jnp.abs(jax.random.normal(next(keys), (c,), jnp.float32))
        return fold_bn(g, b, m, v)

    p = {"conv1_w": conv(7, 7, 3, base), "bn1": bn(base), "layers": []}
    chans = [base, base, 2 * base, 4 * base, 8 * base]
    for li in range(4):
        cin, cout = chans[li], chans[li + 1]
        stride = 1 if li == 0 else 2
        blk = {
            "conv1_w": conv(3, 3, cin, cout), "bn1": bn(cout),
            "conv2_w": conv(3, 3, cout, cout), "bn2": bn(cout),
            "stride": stride,
        }
        if stride != 1 or cin != cout:
            blk["down_w"] = conv(1, 1, cin, cout)
            blk["dbn"] = bn(cout)
        p["layers"].append(blk)
    p["fc_w"] = 0.1 * jax.random.normal(next(keys), (chans[-1], num_classes), jnp.float32)
    p["fc_b"] = 0.05 * jax.random.normal(next(keys), (num_classes,), jnp.float32)
    return p


def basic_block(x, blk):
    # TODO(synk): TSM's temporal channel-shift inside the block's first conv
    # depends on the wrapped model's n_segment (not exposed here); omitted.
    s1, b1 = blk["bn1"]
    s2, b2 = blk["bn2"]
    out = conv2d_bn_act(x, blk["conv1_w"], s1, b1, blk["stride"], 1, relu=True)
    if "down_w" in blk:
        sd, bd = blk["dbn"]
        sc = conv2d_bn_act(x, blk["down_w"], sd, bd, blk["stride"], 0, relu=False)
    else:
        sc = x
    N, H, W, C = out.shape
    # conv2 with the residual add + ReLU fused into its matmul epilogue.
    out = conv2d_bn_act(out, blk["conv2_w"], s2, b2, 1, 1, relu=True,
                        shortcut=sc.reshape(N * H * W, C))
    return out


def mote_tsm_forward(params, x_nchw, motion_nchw, alpha=0.5, beta=0.5):
    x = jnp.transpose(x_nchw, (0, 2, 3, 1)).astype(jnp.float32)        # NCHW -> NHWC
    motion = jnp.transpose(motion_nchw, (0, 2, 3, 1)).astype(jnp.float32)

    s1, b1 = params["bn1"]
    x = conv2d_bn_act(x, params["conv1_w"], s1, b1, stride=2, padding=3, relu=True)
    x = maxpool3x3s2p1_fuse(x, motion, alpha, beta)     # maxpool + alpha*x + beta*motion
    for blk in params["layers"]:
        x = basic_block(x, blk)
    return avgpool_fc(x, params["fc_w"], params["fc_b"])  # (N, num_classes)


if __name__ == "__main__":
    key = jax.random.PRNGKey(0)
    kx, km = jax.random.split(key)
    # x: NCHW image batch; motion must match the post-maxpool feature map
    # (base=8 channels, 32 -> conv1/2 -> 16 -> maxpool/2 -> 8 spatial).
    x = jax.random.normal(kx, (2, 3, 32, 32), jnp.float32)
    motion = jax.random.normal(km, (2, 8, 8, 8), jnp.float32)

    params = init_params(jax.random.PRNGKey(42), base=8, num_classes=10)
    out = mote_tsm_forward(params, x, motion)
    jax.block_until_ready(out)
    assert out.shape == (2, 10) and out.dtype == jnp.float32
    print("KERNEL_OK")
</pallas_src>

<mosaic_0001>
module attributes {stable_mosaic.version = 11 : i64} {
  func.func @_matmul_fused_kernel(%arg0: i32, %arg1: i32, %arg2: memref<512x256xbf16, #tpu.memory_space<vmem>>, %arg3: memref<256x128xbf16, #tpu.memory_space<vmem>>, %arg4: memref<1x128xf32, #tpu.memory_space<vmem>>, %arg5: memref<1x128xf32, #tpu.memory_space<vmem>>, %arg6: memref<512x128xf32, #tpu.memory_space<vmem>>, %arg7: memref<512x128xf32, #tpu.memory_space<vmem>>) attributes {dimension_semantics = [#tpu.dimension_semantics<parallel>, #tpu.dimension_semantics<arbitrary>], iteration_bounds = array<i64: 1, 1>, scalar_prefetch = 0 : i64, scratch_operands = 1 : i64, tpu.core_type = #tpu.core_type<tc>, window_params = [{transform_indices = @transform_0, window_bounds = array<i64: 512, 256>}, {transform_indices = @transform_1, window_bounds = array<i64: 256, 128>}, {pipeline_mode = #tpu.pipeline_mode<synchronous>, transform_indices = @transform_2, window_bounds = array<i64: 1, 128>}, {pipeline_mode = #tpu.pipeline_mode<synchronous>, transform_indices = @transform_3, window_bounds = array<i64: 1, 128>}, {transform_indices = @transform_4, window_bounds = array<i64: 512, 128>}]} {
    %c0_i32 = arith.constant 0 : i32
    %0 = arith.cmpi eq, %arg1, %c0_i32 : i32
    %1 = arith.extui %0 : i1 to i32
    %c0_i32_0 = arith.constant 0 : i32
    %2 = arith.cmpi ne, %1, %c0_i32_0 : i32
    scf.if %2 {
      %cst_10 = arith.constant 0.000000e+00 : f32
      %12 = vector.broadcast %cst_10 : f32 to vector<512x128xf32>
      %c0_11 = arith.constant 0 : index
      %c0_12 = arith.constant 0 : index
      %13 = vector.load %arg7[%c0_11, %c0_12] : memref<512x128xf32, #tpu.memory_space<vmem>>, vector<512x128xf32>
      tpu.vector_store %arg7[%c0_11, %c0_12], %12 {strides = array<i32>} : memref<512x128xf32, #tpu.memory_space<vmem>>, vector<512x128xf32>,
    } else {
    }
    %c0 = arith.constant 0 : index
    %c0_1 = arith.constant 0 : index
    %3 = vector.load %arg7[%c0, %c0_1] : memref<512x128xf32, #tpu.memory_space<vmem>>, vector<512x128xf32>
    %c0_2 = arith.constant 0 : index
    %c0_3 = arith.constant 0 : index
    %4 = vector.load %arg2[%c0_2, %c0_3] : memref<512x256xbf16, #tpu.memory_space<vmem>>, vector<512x256xbf16>
    %c0_4 = arith.constant 0 : index
    %c0_5 = arith.constant 0 : index
    %5 = vector.load %arg3[%c0_4, %c0_5] : memref<256x128xbf16, #tpu.memory_space<vmem>>, vector<256x128xbf16>
    %cst = arith.constant dense<0.000000e+00> : vector<512x128xf32>
    %6 = tpu.matmul %4, %5, %cst {dimension_numbers = #tpu.dot_dimension_numbers<[1], [0], [0], [1], [0, 0, 1, 1], [], []>} : vector<512x256xbf16>, vector<256x128xbf16>, vector<512x128xf32> -> vector<512x128xf32>
    %7 = arith.addf %3, %6 : vector<512x128xf32>
    %c0_6 = arith.constant 0 : index
    %c0_7 = arith.constant 0 : index
    %8 = vector.load %arg7[%c0_6, %c0_7] : memref<512x128xf32, #tpu.memory_space<vmem>>, vector<512x128xf32>
    tpu.vector_store %arg7[%c0_6, %c0_7], %7 {strides = array<i32>} : memref<512x128xf32, #tpu.memory_space<vmem>>, vector<512x128xf32>,
    %c0_i32_8 = arith.constant 0 : i32
    %9 = arith.cmpi eq, %arg1, %c0_i32_8 : i32
    %10 = arith.extui %9 : i1 to i32
    %c0_i32_9 = arith.constant 0 : i32
    %11 = arith.cmpi ne, %10, %c0_i32_9 : i32
    scf.if %11 {
      %c0_10 = arith.constant 0 : index
      %c0_11 = arith.constant 0 : index
      %12 = vector.load %arg7[%c0_10, %c0_11] : memref<512x128xf32, #tpu.memory_space<vmem>>, vector<512x128xf32>
      %c0_12 = arith.constant 0 : index
      %c0_13 = arith.constant 0 : index
      %13 = vector.load %arg4[%c0_12, %c0_13] : memref<1x128xf32, #tpu.memory_space<vmem>>, vector<1x128xf32>
      %14 = vector.broadcast %13 : vector<1x128xf32> to vector<512x128xf32>
      %15 = arith.mulf %12, %14 : vector<512x128xf32>
      %c0_14 = arith.constant 0 : index
      %c0_15 = arith.constant 0 : index
      %16 = vector.load %arg5[%c0_14, %c0_15] : memref<1x128xf32, #tpu.memory_space<vmem>>, vector<1x128xf32>
      %17 = vector.broadcast %16 : vector<1x128xf32> to vector<512x128xf32>
      %18 = arith.addf %15, %17 : vector<512x128xf32>
      %cst_16 = arith.constant 0.000000e+00 : f32
      %19 = vector.broadcast %cst_16 : f32 to vector<512x128xf32>
      %20 = arith.maximumf %18, %19 : vector<512x128xf32>
      %c0_17 = arith.constant 0 : index
      %c0_18 = arith.constant 0 : index
      %21 = vector.load %arg6[%c0_17, %c0_18] : memref<512x128xf32, #tpu.memory_space<vmem>>, vector<512x128xf32>
      tpu.vector_store %arg6[%c0_17, %c0_18], %20 {strides = array<i32>} : memref<512x128xf32, #tpu.memory_space<vmem>>, vector<512x128xf32>,
    } else {
    }
    return
  }
  func.func @transform_0(%arg0: i32, %arg1: i32) -> (i32, i32) {
    %c0_i32 = arith.constant 0 : i32
    return %arg0, %arg1 : i32, i32
  }
  func.func @transform_1(%arg0: i32, %arg1: i32) -> (i32, i32) {
    %c0_i32 = arith.constant 0 : i32
    %c0_i32_0 = arith.constant 0 : i32
    return %arg1, %c0_i32 : i32, i32
  }
  func.func @transform_2(%arg0: i32, %arg1: i32) -> (i32, i32) {
    %c0_i32 = arith.constant 0 : i32
    %c0_i32_0 = arith.constant 0 : i32
    %c0_i32_1 = arith.constant 0 : i32
    return %c0_i32, %c0_i32_0 : i32, i32
  }
  func.func @transform_3(%arg0: i32, %arg1: i32) -> (i32, i32) {
    %c0_i32 = arith.constant 0 : i32
    %c0_i32_0 = arith.constant 0 : i32
    %c0_i32_1 = arith.constant 0 : i32
    return %c0_i32, %c0_i32_0 : i32, i32
  }
  func.func @transform_4(%arg0: i32, %arg1: i32) -> (i32, i32) {
    %c0_i32 = arith.constant 0 : i32
    %c0_i32_0 = arith.constant 0 : i32
    return %arg0, %c0_i32 : i32, i32
  }
}

</mosaic_0001>

<bundles_post_ra>
// kernel: tpu_custom_call.1
= control target key start
LH: loop header
LB: loop body
LE: loop exit
PB: predicated region body
PF: predicated region fallthrough
CT: control target
= control target key end

     0   :  { %9 = vsyncpa [#allocation4], 0  ;;  %s2014_s0 = inlined_call_operand.hbm [shape: bf16[512,256], index: 0, kind: input, shape index: {}]   ;;  %s2015_s1 = inlined_call_operand.hbm [shape: bf16[256,128], index: 1, kind: input, shape index: {}]   ;;  %s2016_s2 = inlined_call_operand.vmem [shape: f32[1,128], index: 2, kind: input, shape index: {}]   ;;  %s2017_s3 = inlined_call_operand.vmem [shape: f32[1,128], index: 3, kind: input, shape index: {}]   ;;  %s2018_s4 = inlined_call_operand.hbm [shape: f32[512,128], index: 4, kind: output, shape index: {}]  }
   0x1   :  { %10 = vsyncpa [#allocation7], 0 }
   0x2   :  { %11 = vsyncpa [#allocation5], 0  ;;  %s1769_s15 = smov [#allocation3]   ;;  %s1697_s19 = scalar_lea.hbm %s2014_s0, 8192 }
   0x3   :  { %s17_s16 = sshll.u32 %s1769_s15, 4  ;;  %p1698_p0 = scmp.ne.s32.totalorder %s2014_s0, %s1697_s19  ;;  %s18_s16 = int_to_ptr.vmem [resolvable:$true] %s17_s16 }
   0x4   :  { %p1701_p1 = scmp.lt.u32.totalorder %s1697_s19, %s2014_s0 }
   0x6   :  { %p1703_p2 = pnand %p1701_p1, %p1698_p0 }
   0x8   :  { %1706 = shalt.err (!%p1703_p2)
}
   0x9   :  { %s1707_s24 = scalar_lea.vmem %s18_s16, 8192  ;;  %p1712_p4 = scmp.lt.s32.totalorder %s18_s16, %s18_s16 }
   0xa   :  { %p1708_p3 = scmp.ne.s32.totalorder %s18_s16, %s1707_s24  ;;  %p1713_p5 = scmp.lt.s32.totalorder %s1707_s24, %s1707_s24 }
   0xc   :  { %p1714_p6 = por %p1713_p5, %p1712_p4 }
   0xe   :  { %p1715_p7 = pnand %p1714_p6, %p1708_p3 }
  0x10   :  { %1718 = shalt.err (!%p1715_p7)
}
  0x11   :  { %s1770_s25 = smov 128   ;;  %s1771_s26 = smov 8  }
  0x12   :  { %23 = dma.hbm_to_vmem [thread:$0]  %s2014_s0, 8192, %s18_s16, [#allocation4], %s1770_s25, %s1770_s25, %s1771_s26  }
  0x13   :  { %s1772_s29 = smov [#allocation6]   ;;  %s1719_s7 = scalar_lea.hbm %s2015_s1, 2048 }
  0x14   :  { %s29_s30 = sshll.u32 %s1772_s29, 4  ;;  %p1720_p8 = scmp.ne.s32.totalorder %s2015_s1, %s1719_s7  ;;  %s30_s30 = int_to_ptr.vmem [resolvable:$true] %s29_s30 }
  0x15   :  { %p1723_p9 = scmp.lt.u32.totalorder %s1719_s7, %s2015_s1 }
  0x17   :  { %p1725_p10 = pnand %p1723_p9, %p1720_p8 }
  0x19   :  { %1728 = shalt.err (!%p1725_p10)
}
  0x1a   :  { %s1729_s12 = scalar_lea.vmem %s30_s30, 2048  ;;  %p1734_p12 = scmp.lt.s32.totalorder %s30_s30, %s30_s30 }
  0x1b   :  { %p1730_p11 = scmp.ne.s32.totalorder %s30_s30, %s1729_s12  ;;  %p1735_p13 = scmp.lt.s32.totalorder %s1729_s12, %s1729_s12 }
  0x1d   :  { %p1736_p0 = por %p1735_p13, %p1734_p12 }
  0x1f   :  { %p1737_p1 = pnand %p1736_p0, %p1730_p11 }
  0x21   :  { %1740 = shalt.err (!%p1737_p1)
}
  0x22   :  { %s1773_s0 = smov 64   ;;  %s1774_s13 = smov 4  }
  0x23   :  { %35 = dma.hbm_to_vmem [thread:$0]  %s2015_s1, 2048, %s30_s30, [#allocation7], %s1773_s0, %s1773_s0, %s1774_s13  }
  0x24   :  { %1763 = dma.done.wait [#allocation4], 8192  }
  0x25   :  { %1764 = vsyncadd [#allocation4], 4294959104 }
  0x26   :  { %1765 = dma.done.wait [#allocation7], 2048  }
  0x27   :  { %1766 = vsyncadd [#allocation7], 4294965248  ;;  %v1775_v0 = vmov 0   ;;  %v1585_v1 = vld [vmem:[#allocation6] sm:$0xff]   ;;  %v1586_v2 = vld [vmem:[#allocation6 + $0x8] sm:$0xff]  }
  0x28   :  { %691 = vmatprep.subr.bf16.mxu0 %v1775_v0  ;;  %1545 = vmatprep.subr.bf16.mxu1 %v1775_v0  ;;  %v1587_v3 = vld [vmem:[#allocation6 + $0x10] sm:$0xff]   ;;  %v1588_v4 = vld [vmem:[#allocation6 + $0x18] sm:$0xff]   ;;  %v1589_v5 = vld [vmem:[#allocation6 + $0x20] sm:$0xff]  }
  0x29   :  { %692 = vmatpush1.bf16.msra.mxu0 %v1585_v1  ;;  %1561 = vmatpush1.bf16.msra.mxu1 %v1585_v1  ;;  %v1603_v6 = vld [vmem:[#allocation3 + $0x4] ss:$8 sps:$4 sm:$0xff]   ;;  %v1591_v9 = vld [vmem:[#allocation6 + $0x30] sm:$0xff]   ;;  %v1592_v10 = vld [vmem:[#allocation6 + $0x38] sm:$0xff]  }
  0x2a   :  { %693 = vmatprep.subr.bf16.mxu0 %v1775_v0  ;;  %1546 = vmatprep.subr.bf16.mxu1 %v1775_v0  ;;  %v1590_v7 = vld [vmem:[#allocation6 + $0x28] sm:$0xff]   ;;  %v1593_v11 = vld [vmem:[#allocation6 + $0x40] sm:$0xff]   ;;  %v1595_v13 = vld [vmem:[#allocation6 + $0x50] sm:$0xff]  }
  0x2b   :  { %v1606_v8 = vld [vmem:[#allocation3 + $0x104] ss:$8 sps:$4 sm:$0xff]   ;;  %723 = vmatprep.mubr.bf16.mxu0 %v1603_v6  ;;  %v1596_v14 = vld [vmem:[#allocation6 + $0x58] sm:$0xff]   ;;  %v1599_v17 = vld [vmem:[#allocation6 + $0x70] sm:$0xff]  }
  0x2c   :  { %851 = vmatprep.mubr.bf16.mxu1 %v1606_v8  ;;  %v1594_v12 = vld [vmem:[#allocation6 + $0x48] sm:$0xff]   ;;  %v1597_v15 = vld [vmem:[#allocation6 + $0x60] sm:$0xff]   ;;  %v1600_v18 = vld [vmem:[#allocation6 + $0x78] sm:$0xff]  }
  0x2d   :  { %694 = vmatpush1.bf16.msra.mxu0 %v1586_v2  ;;  %1562 = vmatpush1.bf16.msra.mxu1 %v1586_v2  ;;  %v1598_v16 = vld [vmem:[#allocation6 + $0x68] sm:$0xff]   ;;  %v1607_v21 = vld [vmem:[#allocation3 + $0x14] ss:$8 sps:$4 sm:$0xff]   ;;  %v1611_v23 = vld [vmem:[#allocation3 + $0x10] ss:$8 sps:$4 sm:$0xff]  }
  0x2e   :  { %695 = vmatprep.subr.bf16.mxu0 %v1775_v0  ;;  %1547 = vmatprep.subr.bf16.mxu1 %v1775_v0  ;;  %v1601_v19 = vld [vmem:[#allocation3] ss:$8 sps:$4 sm:$0xff]   ;;  %v1609_v22 = vld [vmem:[#allocation3 + $0x114] ss:$8 sps:$4 sm:$0xff]   ;;  %v1612_v24 = vld [vmem:[#allocation3 + $0x110] ss:$8 sps:$4 sm:$0xff]  }
  0x2f   :  { %v1604_v20 = vld [vmem:[#allocation3 + $0x100] ss:$8 sps:$4 sm:$0xff]   ;;  %v1613_v25 = vld [vmem:[#allocation3 + $0x24] ss:$8 sps:$4 sm:$0xff]   ;;  %v1619_v29 = vld [vmem:[#allocation3 + $0x34] ss:$8 sps:$4 sm:$0xff]  }
  0x30   :  { %v1615_v26 = vld [vmem:[#allocation3 + $0x124] ss:$8 sps:$4 sm:$0xff]   ;;  %v1617_v27 = vld [vmem:[#allocation3 + $0x20] ss:$8 sps:$4 sm:$0xff]   ;;  %v1621_v30 = vld [vmem:[#allocation3 + $0x134] ss:$8 sps:$4 sm:$0xff]  }
  0x31   :  { %696 = vmatpush1.bf16.msra.mxu0 %v1587_v3  ;;  %1563 = vmatpush1.bf16.msra.mxu1 %v1587_v3  ;;  %v1618_v28 = vld [vmem:[#allocation3 + $0x120] ss:$8 sps:$4 sm:$0xff]   ;;  %v1623_v31 = vld [vmem:[#allocation3 + $0x30] ss:$8 sps:$4 sm:$0xff]   ;;  %v1625_v33 = vld [vmem:[#allocation3 + $0x44] ss:$8 sps:$4 sm:$0xff]  }
  0x32   :  { %697 = vmatprep.subr.bf16.mxu0 %v1775_v0  ;;  %1548 = vmatprep.subr.bf16.mxu1 %v1775_v0  ;;  %v1624_v32 = vld [vmem:[#allocation3 + $0x130] ss:$8 sps:$4 sm:$0xff]   ;;  %v1627_v34 = vld [vmem:[#allocation3 + $0x144] ss:$8 sps:$4 sm:$0xff]   ;;  %v1629_v35 = vld [vmem:[#allocation3 + $0x40] ss:$8 sps:$4 sm:$0xff]  }
  0x33   :  { %v1630_v36 = vld [vmem:[#allocation3 + $0x140] ss:$8 sps:$4 sm:$0xff]   ;;  %v1631_v37 = vld [vmem:[#allocation3 + $0x54] ss:$8 sps:$4 sm:$0xff]   ;;  %v1635_v39 = vld [vmem:[#allocation3 + $0x50] ss:$8 sps:$4 sm:$0xff]  }
  0x34   :  { %v1633_v38 = vld [vmem:[#allocation3 + $0x154] ss:$8 sps:$4 sm:$0xff]   ;;  %v1636_v40 = vld [vmem:[#allocation3 + $0x150] ss:$8 sps:$4 sm:$0xff]   ;;  %v1637_v41 = vld [vmem:[#allocation3 + $0x64] ss:$8 sps:$4 sm:$0xff]  }
  0x35   :  { %698 = vmatpush1.bf16.msra.mxu0 %v1588_v4  ;;  %1564 = vmatpush1.bf16.msra.mxu1 %v1588_v4  ;;  %v1639_v42 = vld [vmem:[#allocation3 + $0x164] ss:$8 sps:$4 sm:$0xff]   ;;  %v1641_v43 = vld [vmem:[#allocation3 + $0x60] ss:$8 sps:$4 sm:$0xff]   ;;  %v1643_v45 = vld [vmem:[#allocation3 + $0x74] ss:$8 sps:$4 sm:$0xff]  }
  0x36   :  { %699 = vmatprep.subr.bf16.mxu0 %v1775_v0  ;;  %1549 = vmatprep.subr.bf16.mxu1 %v1775_v0  ;;  %v1642_v44 = vld [vmem:[#allocation3 + $0x160] ss:$8 sps:$4 sm:$0xff]   ;;  %v1645_v46 = vld [vmem:[#allocation3 + $0x174] ss:$8 sps:$4 sm:$0xff]   ;;  %v1647_v47 = vld [vmem:[#allocation3 + $0x70] ss:$8 sps:$4 sm:$0xff]  }
  0x37   :  { %v1648_v48 = vld [vmem:[#allocation3 + $0x170] ss:$8 sps:$4 sm:$0xff]   ;;  %v1649_v49 = vld [vmem:[#allocation3 + $0x84] ss:$8 sps:$4 sm:$0xff]   ;;  %v1653_v51 = vld [vmem:[#allocation3 + $0x80] ss:$8 sps:$4 sm:$0xff]  }
  0x38   :  { %v1651_v50 = vld [vmem:[#allocation3 + $0x184] ss:$8 sps:$4 sm:$0xff]   ;;  %v1654_v52 = vld [vmem:[#allocation3 + $0x180] ss:$8 sps:$4 sm:$0xff]   ;;  %v1655_v53 = vld [vmem:[#allocation3 + $0x94] ss:$8 sps:$4 sm:$0xff]  }
  0x39   :  { %700 = vmatpush1.bf16.msra.mxu0 %v1589_v5  ;;  %1565 = vmatpush1.bf16.msra.mxu1 %v1589_v5  ;;  %v1657_v54 = vld [vmem:[#allocation3 + $0x194] ss:$8 sps:$4 sm:$0xff]   ;;  %v1659_v55 = vld [vmem:[#allocation3 + $0x90] ss:$8 sps:$4 sm:$0xff]   ;;  %v1661_v57 = vld [vmem:[#allocation3 + $0xa4] ss:$8 sps:$4 sm:$0xff]  }
  0x3a   :  { %701 = vmatprep.subr.bf16.mxu0 %v1775_v0  ;;  %1550 = vmatprep.subr.bf16.mxu1 %v1775_v0  ;;  %v1660_v56 = vld [vmem:[#allocation3 + $0x190] ss:$8 sps:$4 sm:$0xff]   ;;  %v1663_v58 = vld [vmem:[#allocation3 + $0x1a4] ss:$8 sps:$4 sm:$0xff]   ;;  %v1665_v59 = vld [vmem:[#allocation3 + $0xa0] ss:$8 sps:$4 sm:$0xff]  }
  0x3b   :  { %v1666_v60 = vld [vmem:[#allocation3 + $0x1a0] ss:$8 sps:$4 sm:$0xff]   ;;  %v1667_v61 = vld [vmem:[#allocation3 + $0xb4] ss:$8 sps:$4 sm:$0xff]   ;;  %v1671_v63 = vld [vmem:[#allocation3 + $0xb0] ss:$8 sps:$4 sm:$0xff]  }
  0x3c   :  { %v1669_v62 = vld [vmem:[#allocation3 + $0x1b4] ss:$8 sps:$4 sm:$0xff]   ;;  %v1673_v1 = vld [vmem:[#allocation3 + $0xc4] ss:$8 sps:$4 sm:$0xff]   ;;  %v1677_v3 = vld [vmem:[#allocation3 + $0xc0] ss:$8 sps:$4 sm:$0xff]  }
  0x3d   :  { %702 = vmatpush1.bf16.msra.mxu0 %v1590_v7  ;;  %1566 = vmatpush1.bf16.msra.mxu1 %v1590_v7  ;;  %v1675_v2 = vld [vmem:[#allocation3 + $0x1c4] ss:$8 sps:$4 sm:$0xff]   ;;  %v1678_v4 = vld [vmem:[#allocation3 + $0x1c0] ss:$8 sps:$4 sm:$0xff]   ;;  %v1679_v5 = vld [vmem:[#allocation3 + $0xd4] ss:$8 sps:$4 sm:$0xff]  }
  0x3e   :  { %703 = vmatprep.subr.bf16.mxu0 %v1775_v0  ;;  %1551 = vmatprep.subr.bf16.mxu1 %v1775_v0  ;;  %v1681_v6 = vld [vmem:[#allocation3 + $0x1d4] ss:$8 sps:$4 sm:$0xff]   ;;  %v1683_v7 = vld [vmem:[#allocation3 + $0xd0] ss:$8 sps:$4 sm:$0xff]  }
  0x3f   :  { %v1684_v8 = vld [vmem:[#allocation3 + $0x1d0] ss:$8 sps:$4 sm:$0xff]  }
  0x41   :  { %704 = vmatpush1.bf16.msra.mxu0 %v1591_v9  ;;  %1567 = vmatpush1.bf16.msra.mxu1 %v1591_v9  ;;  %v1685_v9 = vld [vmem:[#allocation3 + $0xe4] ss:$8 sps:$4 sm:$0xff]  }
  0x42   :  { %705 = vmatprep.subr.bf16.mxu0 %v1775_v0  ;;  %1552 = vmatprep.subr.bf16.mxu1 %v1775_v0 }
  0x45   :  { %706 = vmatpush1.bf16.msra.mxu0 %v1592_v10  ;;  %1568 = vmatpush1.bf16.msra.mxu1 %v1592_v10  ;;  %v1687_v10 = vld [vmem:[#allocation3 + $0x1e4] ss:$8 sps:$4 sm:$0xff]  }
  0x46   :  { %707 = vmatprep.subr.bf16.mxu0 %v1775_v0  ;;  %1553 = vmatprep.subr.bf16.mxu1 %v1775_v0 }
  0x49   :  { %708 = vmatpush1.bf16.msra.mxu0 %v1593_v11  ;;  %1569 = vmatpush1.bf16.msra.mxu1 %v1593_v11  ;;  %v1689_v11 = vld [vmem:[#allocation3 + $0xe0] ss:$8 sps:$4 sm:$0xff]  }
  0x4a   :  { %709 = vmatprep.subr.bf16.mxu0 %v1775_v0  ;;  %1554 = vmatprep.subr.bf16.mxu1 %v1775_v0 }
  0x4d   :  { %710 = vmatpush1.bf16.msra.mxu0 %v1594_v12  ;;  %1570 = vmatpush1.bf16.msra.mxu1 %v1594_v12  ;;  %v1690_v12 = vld [vmem:[#allocation3 + $0x1e0] ss:$8 sps:$4 sm:$0xff]  }
  0x4e   :  { %711 = vmatprep.subr.bf16.mxu0 %v1775_v0  ;;  %1555 = vmatprep.subr.bf16.mxu1 %v1775_v0 }
  0x51   :  { %712 = vmatpush1.bf16.msra.mxu0 %v1595_v13  ;;  %1571 = vmatpush1.bf16.msra.mxu1 %v1595_v13  ;;  %v1691_v13 = vld [vmem:[#allocation3 + $0xf4] ss:$8 sps:$4 sm:$0xff]  }
  0x52   :  { %713 = vmatprep.subr.bf16.mxu0 %v1775_v0  ;;  %1556 = vmatprep.subr.bf16.mxu1 %v1775_v0 }
  0x55   :  { %714 = vmatpush1.bf16.msra.mxu0 %v1596_v14  ;;  %1572 = vmatpush1.bf16.msra.mxu1 %v1596_v14  ;;  %v1693_v14 = vld [vmem:[#allocation3 + $0x1f4] ss:$8 sps:$4 sm:$0xff]  }
  0x56   :  { %715 = vmatprep.subr.bf16.mxu0 %v1775_v0  ;;  %1557 = vmatprep.subr.bf16.mxu1 %v1775_v0 }
  0x59   :  { %716 = vmatpush1.bf16.msra.mxu0 %v1597_v15  ;;  %1573 = vmatpush1.bf16.msra.mxu1 %v1597_v15  ;;  %v1695_v15 = vld [vmem:[#allocation3 + $0xf0] ss:$8 sps:$4 sm:$0xff]  }
  0x5a   :  { %717 = vmatprep.subr.bf16.mxu0 %v1775_v0  ;;  %1558 = vmatprep.subr.bf16.mxu1 %v1775_v0 }
  0x5d   :  { %718 = vmatpush1.bf16.msra.mxu0 %v1598_v16  ;;  %1574 = vmatpush1.bf16.msra.mxu1 %v1598_v16  ;;  %v1696_v16 = vld [vmem:[#allocation3 + $0x1f0] ss:$8 sps:$4 sm:$0xff]  }
  0x5e   :  { %719 = vmatprep.subr.bf16.mxu0 %v1775_v0  ;;  %1559 = vmatprep.subr.bf16.mxu1 %v1775_v0 }
  0x61   :  { %720 = vmatpush1.bf16.msra.mxu0 %v1599_v17  ;;  %1575 = vmatpush1.bf16.msra.mxu1 %v1599_v17  ;;  %v1864_v17 = vld [vmem:[%s2016_s2] ss:$0 sm:$0xff]  ;;  %s1776_s2 = smov [#allocation8]  }
  0x62   :  { %721 = vmatprep.subr.bf16.mxu0 %v1775_v0  ;;  %1560 = vmatprep.subr.bf16.mxu1 %v1775_v0  ;;  %v1672_v0 = vld [vmem:[#allocation3 + $0x1b0] ss:$8 sps:$4 sm:$0xff]  }
  0x65   :  { %722 = vmatpush1.bf16.msra.mxu0 %v1600_v18  ;;  %1576 = vmatpush1.bf16.msra.mxu1 %v1600_v18 }
  0x68   :  { %724 = vmatmul.mubr.bf16.vlgmr.msra.gmra.mrb[0].mxu0 %v1601_v19  ;;  %852 = vmatmul.mubr.bf16.vlgmr.msra.gmra.mrb[0].mxu1 %v1604_v20  ;;  %v1869_v19 = vld [vmem:[%s2017_s3] ss:$0 sm:$0xff]  ;;  %s1450_s3 = sshll.u32 %s1776_s2, 4  ;;  %s1451_s3 = int_to_ptr.vmem [resolvable:$true] %s1450_s3 }
  0x69   :  { %731 = vmatprep.mubr.bf16.mxu0 %v1607_v21  ;;  %859 = vmatprep.mubr.bf16.mxu1 %v1609_v22  ;;  %s1741_s19 = scalar_lea.vmem %s1451_s3, 8192  ;;  %p1746_p3 = scmp.lt.s32.totalorder %s1451_s3, %s1451_s3 }
  0x6a   :  { %p1742_p2 = scmp.ne.s32.totalorder %s1451_s3, %s1741_s19  ;;  %p1747_p4 = scmp.lt.s32.totalorder %s1741_s19, %s1741_s19 }
  0x6c   :  { %p1748_p5 = por %p1747_p4, %p1746_p3 }
  0x6e   :  { %p1749_p6 = pnand %p1748_p5, %p1742_p2 }
  0x70   :  { %732 = vmatmul.mubr.bf16.gmra.mrb[4].mxu0 %v1611_v23  ;;  %860 = vmatmul.mubr.bf16.gmra.mrb[4].mxu1 %v1612_v24 }
  0x71   :  { %739 = vmatprep.mubr.bf16.mxu0 %v1613_v25  ;;  %867 = vmatprep.mubr.bf16.mxu1 %v1615_v26 }
  0x78   :  { %740 = vmatmul.mubr.bf16.gmra.mrb[8].mxu0 %v1617_v27  ;;  %868 = vmatmul.mubr.bf16.gmra.mrb[8].mxu1 %v1618_v28 }
  0x79   :  { %747 = vmatprep.mubr.bf16.mxu0 %v1619_v29  ;;  %875 = vmatprep.mubr.bf16.mxu1 %v1621_v30 }
  0x80   :  { %748 = vmatmul.mubr.bf16.gmra.mrb[12].mxu0 %v1623_v31  ;;  %876 = vmatmul.mubr.bf16.gmra.mrb[12].mxu1 %v1624_v32 }
  0x81   :  { %755 = vmatprep.mubr.bf16.mxu0 %v1625_v33  ;;  %883 = vmatprep.mubr.bf16.mxu1 %v1627_v34 }
  0x88   :  { %756 = vmatmul.mubr.bf16.gmra.mrb[16].mxu0 %v1629_v35  ;;  %884 = vmatmul.mubr.bf16.gmra.mrb[16].mxu1 %v1630_v36 }
  0x89   :  { %763 = vmatprep.mubr.bf16.mxu0 %v1631_v37  ;;  %891 = vmatprep.mubr.bf16.mxu1 %v1633_v38 }
  0x90   :  { %764 = vmatmul.mubr.bf16.gmra.mrb[20].mxu0 %v1635_v39  ;;  %892 = vmatmul.mubr.bf16.gmra.mrb[20].mxu1 %v1636_v40 }
  0x91   :  { %771 = vmatprep.mubr.bf16.mxu0 %v1637_v41  ;;  %899 = vmatprep.mubr.bf16.mxu1 %v1639_v42 }
  0x98   :  { %772 = vmatmul.mubr.bf16.gmra.mrb[24].mxu0 %v1641_v43  ;;  %900 = vmatmul.mubr.bf16.gmra.mrb[24].mxu1 %v1642_v44 }
  0x99   :  { %779 = vmatprep.mubr.bf16.mxu0 %v1643_v45  ;;  %907 = vmatprep.mubr.bf16.mxu1 %v1645_v46 }
  0xa0   :  { %780 = vmatmul.mubr.bf16.gmra.mrb[28].mxu0 %v1647_v47  ;;  %908 = vmatmul.mubr.bf16.gmra.mrb[28].mxu1 %v1648_v48 }
  0xa1   :  { %787 = vmatprep.mubr.bf16.mxu0 %v1649_v49  ;;  %915 = vmatprep.mubr.bf16.mxu1 %v1651_v50 }
  0xa8   :  { %788 = vmatmul.mubr.bf16.gmra.mrb[32].mxu0 %v1653_v51  ;;  %916 = vmatmul.mubr.bf16.gmra.mrb[32].mxu1 %v1654_v52 }
  0xa9   :  { %795 = vmatprep.mubr.bf16.mxu0 %v1655_v53  ;;  %923 = vmatprep.mubr.bf16.mxu1 %v1657_v54 }
  0xb0   :  { %796 = vmatmul.mubr.bf16.gmra.mrb[36].mxu0 %v1659_v55  ;;  %924 = vmatmul.mubr.bf16.gmra.mrb[36].mxu1 %v1660_v56 }
  0xb1   :  { %803 = vmatprep.mubr.bf16.mxu0 %v1661_v57  ;;  %931 = vmatprep.mubr.bf16.mxu1 %v1663_v58 }
  0xb8   :  { %804 = vmatmul.mubr.bf16.gmra.mrb[40].mxu0 %v1665_v59  ;;  %932 = vmatmul.mubr.bf16.gmra.mrb[40].mxu1 %v1666_v60 }
  0xb9   :  { %811 = vmatprep.mubr.bf16.mxu0 %v1667_v61  ;;  %939 = vmatprep.mubr.bf16.mxu1 %v1669_v62 }
  0xc0   :  { %812 = vmatmul.mubr.bf16.gmra.mrb[44].mxu0 %v1671_v63  ;;  %940 = vmatmul.mubr.bf16.gmra.mrb[44].mxu1 %v1672_v0 }
  0xc1   :  { %819 = vmatprep.mubr.bf16.mxu0 %v1673_v1  ;;  %947 = vmatprep.mubr.bf16.mxu1 %v1675_v2 }
  0xc8   :  { %820 = vmatmul.mubr.bf16.gmra.mrb[48].mxu0 %v1677_v3  ;;  %948 = vmatmul.mubr.bf16.gmra.mrb[48].mxu1 %v1678_v4 }
  0xc9   :  { %827 = vmatprep.mubr.bf16.mxu0 %v1679_v5  ;;  %955 = vmatprep.mubr.bf16.mxu1 %v1681_v6 }
  0xd0   :  { %828 = vmatmul.mubr.bf16.gmra.mrb[52].mxu0 %v1683_v7  ;;  %956 = vmatmul.mubr.bf16.gmra.mrb[52].mxu1 %v1684_v8 }
  0xd1   :  { %835 = vmatprep.mubr.bf16.mxu0 %v1685_v9  ;;  %963 = vmatprep.mubr.bf16.mxu1 %v1687_v10 }
  0xd8   :  { %836 = vmatmul.mubr.bf16.gmra.mrb[56].mxu0 %v1689_v11  ;;  %964 = vmatmul.mubr.bf16.gmra.mrb[56].mxu1 %v1690_v12 }
  0xd9   :  { %843 = vmatprep.mubr.bf16.mxu0 %v1691_v13  ;;  %971 = vmatprep.mubr.bf16.mxu1 %v1693_v14 }
  0xe0   :  { %844 = vmatmul.mubr.bf16.gmra.mrb[60].mxu0 %v1695_v15  ;;  %972 = vmatmul.mubr.bf16.gmra.mrb[60].mxu1 %v1696_v16 }
 0x13b   :  { %v725_v18 = vpop.f32.mrb[0].mxu0  ;;  %v853_v20 = vpop.f32.mrb[0].mxu1 }
 0x13c   :  { %v1182_v21 = vmul.f32 %v1864_v17, %v725_v18  ;;  %v1214_v22 = vmul.f32 %v1864_v17, %v853_v20  ;;  %v727_v23 = vpop.f32.mrb[1].mxu0  ;;  %v855_v24 = vpop.f32.mrb[1].mxu1 }
 0x13d   :  { %v728_v25 = vpop.f32.mrb[2].mxu0  ;;  %v856_v26 = vpop.f32.mrb[2].mxu1 }
 0x13e   :  { %v1253_v27 = vadd.f32 %v1869_v19, %v1182_v21  ;;  %v1285_v28 = vadd.f32 %v1869_v19, %v1214_v22  ;;  %v1183_v29 = vmul.f32 %v1864_v17, %v728_v25  ;;  %v1215_v30 = vmul.f32 %v1864_v17, %v856_v26  ;;  %v730_v31 = vpop.f32.mrb[3].mxu0  ;;  %v858_v32 = vpop.f32.mrb[3].mxu1 }
 0x140   :  { %v1317_v33 = vmax.f32 %v1253_v27, 0.0  ;;  %v1349_v34 = vmax.f32 %v1285_v28, 0.0  ;;  %v1254_v35 = vadd.f32 %v1869_v19, %v1183_v29  ;;  %v1286_v36 = vadd.f32 %v1869_v19, %v1215_v30 }
 0x142   :  { %1381 = vst [vmem:[#allocation8] sm:$0xff] %v1317_v33  ;;  %1413 = vst [vmem:[#allocation8 + $0x100] sm:$0xff] %v1349_v34  ;;  %v1318_v37 = vmax.f32 %v1254_v35, 0.0  ;;  %v1350_v38 = vmax.f32 %v1286_v36, 0.0 }
 0x143   :  { %v733_v39 = vpop.f32.mrb[4].mxu0  ;;  %v861_v40 = vpop.f32.mrb[4].mxu1 }
 0x144   :  { %1382 = vst [vmem:[#allocation8 + $0x8] sm:$0xff] %v1318_v37  ;;  %1414 = vst [vmem:[#allocation8 + $0x108] sm:$0xff] %v1350_v38  ;;  %v1184_v41 = vmul.f32 %v1864_v17, %v733_v39  ;;  %v1216_v42 = vmul.f32 %v1864_v17, %v861_v40  ;;  %v735_v43 = vpop.f32.mrb[5].mxu0  ;;  %v863_v44 = vpop.f32.mrb[5].mxu1 }
 0x145   :  { %v736_v45 = vpop.f32.mrb[6].mxu0  ;;  %v864_v46 = vpop.f32.mrb[6].mxu1 }
 0x146   :  { %v1255_v47 = vadd.f32 %v1869_v19, %v1184_v41  ;;  %v1287_v48 = vadd.f32 %v1869_v19, %v1216_v42  ;;  %v1185_v49 = vmul.f32 %v1864_v17, %v736_v45  ;;  %v1217_v50 = vmul.f32 %v1864_v17, %v864_v46  ;;  %v738_v51 = vpop.f32.mrb[7].mxu0  ;;  %v866_v52 = vpop.f32.mrb[7].mxu1 }
 0x148   :  { %v1319_v53 = vmax.f32 %v1255_v47, 0.0  ;;  %v1351_v54 = vmax.f32 %v1287_v48, 0.0  ;;  %v1256_v55 = vadd.f32 %v1869_v19, %v1185_v49  ;;  %v1288_v56 = vadd.f32 %v1869_v19, %v1217_v50 }
 0x14a   :  { %1383 = vst [vmem:[#allocation8 + $0x10] sm:$0xff] %v1319_v53  ;;  %1415 = vst [vmem:[#allocation8 + $0x110] sm:$0xff] %v1351_v54  ;;  %v1320_v57 = vmax.f32 %v1256_v55, 0.0  ;;  %v1352_v58 = vmax.f32 %v1288_v56, 0.0 }
 0x14b   :  { %v741_v59 = vpop.f32.mrb[8].mxu0  ;;  %v869_v60 = vpop.f32.mrb[8].mxu1 }
 0x14c   :  { %1384 = vst [vmem:[#allocation8 + $0x18] sm:$0xff] %v1320_v57  ;;  %1416 = vst [vmem:[#allocation8 + $0x118] sm:$0xff] %v1352_v58  ;;  %v1186_v61 = vmul.f32 %v1864_v17, %v741_v59  ;;  %v1218_v62 = vmul.f32 %v1864_v17, %v869_v60  ;;  %v743_v63 = vpop.f32.mrb[9].mxu0  ;;  %v871_v0 = vpop.f32.mrb[9].mxu1 }
 0x14d   :  { %v744_v1 = vpop.f32.mrb[10].mxu0  ;;  %v872_v2 = vpop.f32.mrb[10].mxu1 }
 0x14e   :  { %v1257_v3 = vadd.f32 %v1869_v19, %v1186_v61  ;;  %v1289_v4 = vadd.f32 %v1869_v19, %v1218_v62  ;;  %v1187_v5 = vmul.f32 %v1864_v17, %v744_v1  ;;  %v1219_v6 = vmul.f32 %v1864_v17, %v872_v2  ;;  %v746_v7 = vpop.f32.mrb[11].mxu0  ;;  %v874_v8 = vpop.f32.mrb[11].mxu1 }
 0x150   :  { %v1321_v9 = vmax.f32 %v1257_v3, 0.0  ;;  %v1353_v10 = vmax.f32 %v1289_v4, 0.0  ;;  %v1258_v11 = vadd.f32 %v1869_v19, %v1187_v5  ;;  %v1290_v12 = vadd.f32 %v1869_v19, %v1219_v6 }
 0x152   :  { %1385 = vst [vmem:[#allocation8 + $0x20] sm:$0xff] %v1321_v9  ;;  %1417 = vst [vmem:[#allocation8 + $0x120] sm:$0xff] %v1353_v10  ;;  %v1322_v13 = vmax.f32 %v1258_v11, 0.0  ;;  %v1354_v14 = vmax.f32 %v1290_v12, 0.0 }
 0x153   :  { %v749_v15 = vpop.f32.mrb[12].mxu0  ;;  %v877_v16 = vpop.f32.mrb[12].mxu1 }
 0x154   :  { %1386 = vst [vmem:[#allocation8 + $0x28] sm:$0xff] %v1322_v13  ;;  %1418 = vst [vmem:[#allocation8 + $0x128] sm:$0xff] %v1354_v14  ;;  %v1188_v18 = vmul.f32 %v1864_v17, %v749_v15  ;;  %v1220_v20 = vmul.f32 %v1864_v17, %v877_v16  ;;  %v751_v21 = vpop.f32.mrb[13].mxu0  ;;  %v879_v22 = vpop.f32.mrb[13].mxu1 }
 0x155   :  { %v752_v23 = vpop.f32.mrb[14].mxu0  ;;  %v880_v24 = vpop.f32.mrb[14].mxu1 }
 0x156   :  { %v1259_v25 = vadd.f32 %v1869_v19, %v1188_v18  ;;  %v1291_v26 = vadd.f32 %v1869_v19, %v1220_v20  ;;  %v1189_v27 = vmul.f32 %v1864_v17, %v752_v23  ;;  %v1221_v28 = vmul.f32 %v1864_v17, %v880_v24  ;;  %v754_v29 = vpop.f32.mrb[15].mxu0  ;;  %v882_v30 = vpop.f32.mrb[15].mxu1 }
 0x158   :  { %v1323_v31 = vmax.f32 %v1259_v25, 0.0  ;;  %v1355_v32 = vmax.f32 %v1291_v26, 0.0  ;;  %v1260_v33 = vadd.f32 %v1869_v19, %v1189_v27  ;;  %v1292_v34 = vadd.f32 %v1869_v19, %v1221_v28 }
 0x15a   :  { %1387 = vst [vmem:[#allocation8 + $0x30] sm:$0xff] %v1323_v31  ;;  %1419 = vst [vmem:[#allocation8 + $0x130] sm:$0xff] %v1355_v32  ;;  %v1324_v35 = vmax.f32 %v1260_v33, 0.0  ;;  %v1356_v36 = vmax.f32 %v1292_v34, 0.0 }
 0x15b   :  { %v757_v37 = vpop.f32.mrb[16].mxu0  ;;  %v885_v38 = vpop.f32.mrb[16].mxu1 }
 0x15c   :  { %1388 = vst [vmem:[#allocation8 + $0x38] sm:$0xff] %v1324_v35  ;;  %1420 = vst [vmem:[#allocation8 + $0x138] sm:$0xff] %v1356_v36  ;;  %v1190_v39 = vmul.f32 %v1864_v17, %v757_v37  ;;  %v1222_v40 = vmul.f32 %v1864_v17, %v885_v38  ;;  %v759_v41 = vpop.f32.mrb[17].mxu0  ;;  %v887_v42 = vpop.f32.mrb[17].mxu1 }
 0x15d   :  { %v760_v43 = vpop.f32.mrb[18].mxu0  ;;  %v888_v44 = vpop.f32.mrb[18].mxu1 }
 0x15e   :  { %v1261_v45 = vadd.f32 %v1869_v19, %v1190_v39  ;;  %v1293_v46 = vadd.f32 %v1869_v19, %v1222_v40  ;;  %v1191_v47 = vmul.f32 %v1864_v17, %v760_v43  ;;  %v1223_v48 = vmul.f32 %v1864_v17, %v888_v44  ;;  %v762_v49 = vpop.f32.mrb[19].mxu0  ;;  %v890_v50 = vpop.f32.mrb[19].mxu1 }
 0x160   :  { %v1325_v51 = vmax.f32 %v1261_v45, 0.0  ;;  %v1357_v52 = vmax.f32 %v1293_v46, 0.0  ;;  %v1262_v53 = vadd.f32 %v1869_v19, %v1191_v47  ;;  %v1294_v54 = vadd.f32 %v1869_v19, %v1223_v48 }
 0x162   :  { %1389 = vst [vmem:[#allocation8 + $0x40] sm:$0xff] %v1325_v51  ;;  %1421 = vst [vmem:[#allocation8 + $0x140] sm:$0xff] %v1357_v52  ;;  %v1326_v55 = vmax.f32 %v1262_v53, 0.0  ;;  %v1358_v56 = vmax.f32 %v1294_v54, 0.0 }
 0x163   :  { %v765_v57 = vpop.f32.mrb[20].mxu0  ;;  %v893_v58 = vpop.f32.mrb[20].mxu1 }
 0x164   :  { %1390 = vst [vmem:[#allocation8 + $0x48] sm:$0xff] %v1326_v55  ;;  %1422 = vst [vmem:[#allocation8 + $0x148] sm:$0xff] %v1358_v56  ;;  %v1192_v59 = vmul.f32 %v1864_v17, %v765_v57  ;;  %v1224_v60 = vmul.f32 %v1864_v17, %v893_v58  ;;  %v767_v61 = vpop.f32.mrb[21].mxu0  ;;  %v895_v62 = vpop.f32.mrb[21].mxu1 }
 0x165   :  { %v768_v63 = vpop.f32.mrb[22].mxu0  ;;  %v896_v0 = vpop.f32.mrb[22].mxu1 }
 0x166   :  { %v1263_v1 = vadd.f32 %v1869_v19, %v1192_v59  ;;  %v1295_v2 = vadd.f32 %v1869_v19, %v1224_v60  ;;  %v1193_v3 = vmul.f32 %v1864_v17, %v768_v63  ;;  %v1225_v4 = vmul.f32 %v1864_v17, %v896_v0  ;;  %v770_v5 = vpop.f32.mrb[23].mxu0  ;;  %v898_v6 = vpop.f32.mrb[23].mxu1 }
 0x168   :  { %v1327_v7 = vmax.f32 %v1263_v1, 0.0  ;;  %v1359_v8 = vmax.f32 %v1295_v2, 0.0  ;;  %v1264_v9 = vadd.f32 %v1869_v19, %v1193_v3  ;;  %v1296_v10 = vadd.f32 %v1869_v19, %v1225_v4 }
 0x16a   :  { %1391 = vst [vmem:[#allocation8 + $0x50] sm:$0xff] %v1327_v7  ;;  %1423 = vst [vmem:[#allocation8 + $0x150] sm:$0xff] %v1359_v8  ;;  %v1328_v11 = vmax.f32 %v1264_v9, 0.0  ;;  %v1360_v12 = vmax.f32 %v1296_v10, 0.0 }
 0x16b   :  { %v773_v13 = vpop.f32.mrb[24].mxu0  ;;  %v901_v14 = vpop.f32.mrb[24].mxu1 }
 0x16c   :  { %1392 = vst [vmem:[#allocation8 + $0x58] sm:$0xff] %v1328_v11  ;;  %1424 = vst [vmem:[#allocation8 + $0x158] sm:$0xff] %v1360_v12  ;;  %v1194_v15 = vmul.f32 %v1864_v17, %v773_v13  ;;  %v1226_v16 = vmul.f32 %v1864_v17, %v901_v14  ;;  %v775_v18 = vpop.f32.mrb[25].mxu0  ;;  %v903_v20 = vpop.f32.mrb[25].mxu1 }
 0x16d   :  { %v776_v21 = vpop.f32.mrb[26].mxu0  ;;  %v904_v22 = vpop.f32.mrb[26].mxu1 }
 0x16e   :  { %v1265_v23 = vadd.f32 %v1869_v19, %v1194_v15  ;;  %v1297_v24 = vadd.f32 %v1869_v19, %v1226_v16  ;;  %v1195_v25 = vmul.f32 %v1864_v17, %v776_v21  ;;  %v1227_v26 = vmul.f32 %v1864_v17, %v904_v22  ;;  %v778_v27 = vpop.f32.mrb[27].mxu0  ;;  %v906_v28 = vpop.f32.mrb[27].mxu1 }
 0x170   :  { %v1329_v29 = vmax.f32 %v1265_v23, 0.0  ;;  %v1361_v30 = vmax.f32 %v1297_v24, 0.0  ;;  %v1266_v31 = vadd.f32 %v1869_v19, %v1195_v25  ;;  %v1298_v32 = vadd.f32 %v1869_v19, %v1227_v26 }
 0x172   :  { %1393 = vst [vmem:[#allocation8 + $0x60] sm:$0xff] %v1329_v29  ;;  %1425 = vst [vmem:[#allocation8 + $0x160] sm:$0xff] %v1361_v30  ;;  %v1330_v33 = vmax.f32 %v1266_v31, 0.0  ;;  %v1362_v34 = vmax.f32 %v1298_v32, 0.0 }
 0x173   :  { %v781_v35 = vpop.f32.mrb[28].mxu0  ;;  %v909_v36 = vpop.f32.mrb[28].mxu1 }
 0x174   :  { %1394 = vst [vmem:[#allocation8 + $0x68] sm:$0xff] %v1330_v33  ;;  %1426 = vst [vmem:[#allocation8 + $0x168] sm:$0xff] %v1362_v34  ;;  %v1196_v37 = vmul.f32 %v1864_v17, %v781_v35  ;;  %v1228_v38 = vmul.f32 %v1864_v17, %v909_v36  ;;  %v783_v39 = vpop.f32.mrb[29].mxu0  ;;  %v911_v40 = vpop.f32.mrb[29].mxu1 }
 0x175   :  { %v784_v41 = vpop.f32.mrb[30].mxu0  ;;  %v912_v42 = vpop.f32.mrb[30].mxu1 }
 0x176   :  { %v1267_v43 = vadd.f32 %v1869_v19, %v1196_v37  ;;  %v1299_v44 = vadd.f32 %v1869_v19, %v1228_v38  ;;  %v1197_v45 = vmul.f32 %v1864_v17, %v784_v41  ;;  %v1229_v46 = vmul.f32 %v1864_v17, %v912_v42  ;;  %v786_v47 = vpop.f32.mrb[31].mxu0  ;;  %v914_v48 = vpop.f32.mrb[31].mxu1 }
 0x178   :  { %v1331_v49 = vmax.f32 %v1267_v43, 0.0  ;;  %v1363_v50 = vmax.f32 %v1299_v44, 0.0  ;;  %v1268_v51 = vadd.f32 %v1869_v19, %v1197_v45  ;;  %v1300_v52 = vadd.f32 %v1869_v19, %v1229_v46 }
 0x17a   :  { %1395 = vst [vmem:[#allocation8 + $0x70] sm:$0xff] %v1331_v49  ;;  %1427 = vst [vmem:[#allocation8 + $0x170] sm:$0xff] %v1363_v50  ;;  %v1332_v53 = vmax.f32 %v1268_v51, 0.0  ;;  %v1364_v54 = vmax.f32 %v1300_v52, 0.0 }
 0x17b   :  { %v789_v55 = vpop.f32.mrb[32].mxu0  ;;  %v917_v56 = vpop.f32.mrb[32].mxu1 }
 0x17c   :  { %1396 = vst [vmem:[#allocation8 + $0x78] sm:$0xff] %v1332_v53  ;;  %1428 = vst [vmem:[#allocation8 + $0x178] sm:$0xff] %v1364_v54  ;;  %v1198_v57 = vmul.f32 %v1864_v17, %v789_v55  ;;  %v1230_v58 = vmul.f32 %v1864_v17, %v917_v56  ;;  %v791_v59 = vpop.f32.mrb[33].mxu0  ;;  %v919_v60 = vpop.f32.mrb[33].mxu1 }
 0x17d   :  { %v792_v61 = vpop.f32.mrb[34].mxu0  ;;  %v920_v62 = vpop.f32.mrb[34].mxu1 }
 0x17e   :  { %v1269_v63 = vadd.f32 %v1869_v19, %v1198_v57  ;;  %v1301_v0 = vadd.f32 %v1869_v19, %v1230_v58  ;;  %v1199_v1 = vmul.f32 %v1864_v17, %v792_v61  ;;  %v1231_v2 = vmul.f32 %v1864_v17, %v920_v62  ;;  %v794_v3 = vpop.f32.mrb[35].mxu0  ;;  %v922_v4 = vpop.f32.mrb[35].mxu1 }
 0x180   :  { %v1333_v5 = vmax.f32 %v1269_v63, 0.0  ;;  %v1365_v6 = vmax.f32 %v1301_v0, 0.0  ;;  %v1270_v7 = vadd.f32 %v1869_v19, %v1199_v1  ;;  %v1302_v8 = vadd.f32 %v1869_v19, %v1231_v2 }
 0x182   :  { %1397 = vst [vmem:[#allocation8 + $0x80] sm:$0xff] %v1333_v5  ;;  %1429 = vst [vmem:[#allocation8 + $0x180] sm:$0xff] %v1365_v6  ;;  %v1334_v9 = vmax.f32 %v1270_v7, 0.0  ;;  %v1366_v10 = vmax.f32 %v1302_v8, 0.0 }
 0x183   :  { %v797_v11 = vpop.f32.mrb[36].mxu0  ;;  %v925_v12 = vpop.f32.mrb[36].mxu1 }
 0x184   :  { %1398 = vst [vmem:[#allocation8 + $0x88] sm:$0xff] %v1334_v9  ;;  %1430 = vst [vmem:[#allocation8 + $0x188] sm:$0xff] %v1366_v10  ;;  %v1200_v13 = vmul.f32 %v1864_v17, %v797_v11  ;;  %v1232_v14 = vmul.f32 %v1864_v17, %v925_v12  ;;  %v799_v15 = vpop.f32.mrb[37].mxu0  ;;  %v927_v16 = vpop.f32.mrb[37].mxu1 }
 0x185   :  { %v800_v18 = vpop.f32.mrb[38].mxu0  ;;  %v928_v20 = vpop.f32.mrb[38].mxu1 }
 0x186   :  { %v1271_v21 = vadd.f32 %v1869_v19, %v1200_v13  ;;  %v1303_v22 = vadd.f32 %v1869_v19, %v1232_v14  ;;  %v1201_v23 = vmul.f32 %v1864_v17, %v800_v18  ;;  %v1233_v24 = vmul.f32 %v1864_v17, %v928_v20  ;;  %v802_v25 = vpop.f32.mrb[39].mxu0  ;;  %v930_v26 = vpop.f32.mrb[39].mxu1 }
 0x188   :  { %v1335_v27 = vmax.f32 %v1271_v21, 0.0  ;;  %v1367_v28 = vmax.f32 %v1303_v22, 0.0  ;;  %v1272_v29 = vadd.f32 %v1869_v19, %v1201_v23  ;;  %v1304_v30 = vadd.f32 %v1869_v19, %v1233_v24 }
 0x18a   :  { %1399 = vst [vmem:[#allocation8 + $0x90] sm:$0xff] %v1335_v27  ;;  %1431 = vst [vmem:[#allocation8 + $0x190] sm:$0xff] %v1367_v28  ;;  %v1336_v31 = vmax.f32 %v1272_v29, 0.0  ;;  %v1368_v32 = vmax.f32 %v1304_v30, 0.0 }
 0x18b   :  { %v805_v33 = vpop.f32.mrb[40].mxu0  ;;  %v933_v34 = vpop.f32.mrb[40].mxu1 }
 0x18c   :  { %1400 = vst [vmem:[#allocation8 + $0x98] sm:$0xff] %v1336_v31  ;;  %1432 = vst [vmem:[#allocation8 + $0x198] sm:$0xff] %v1368_v32  ;;  %v1202_v35 = vmul.f32 %v1864_v17, %v805_v33  ;;  %v1234_v36 = vmul.f32 %v1864_v17, %v933_v34  ;;  %v807_v37 = vpop.f32.mrb[41].mxu0  ;;  %v935_v38 = vpop.f32.mrb[41].mxu1 }
 0x18d   :  { %v808_v39 = vpop.f32.mrb[42].mxu0  ;;  %v936_v40 = vpop.f32.mrb[42].mxu1 }
 0x18e   :  { %v1273_v41 = vadd.f32 %v1869_v19, %v1202_v35  ;;  %v1305_v42 = vadd.f32 %v1869_v19, %v1234_v36  ;;  %v1203_v43 = vmul.f32 %v1864_v17, %v808_v39  ;;  %v1235_v44 = vmul.f32 %v1864_v17, %v936_v40  ;;  %v810_v45 = vpop.f32.mrb[43].mxu0  ;;  %v938_v46 = vpop.f32.mrb[43].mxu1 }
 0x190   :  { %v1337_v47 = vmax.f32 %v1273_v41, 0.0  ;;  %v1369_v48 = vmax.f32 %v1305_v42, 0.0  ;;  %v1274_v49 = vadd.f32 %v1869_v19, %v1203_v43  ;;  %v1306_v50 = vadd.f32 %v1869_v19, %v1235_v44 }
 0x192   :  { %1401 = vst [vmem:[#allocation8 + $0xa0] sm:$0xff] %v1337_v47  ;;  %1433 = vst [vmem:[#allocation8 + $0x1a0] sm:$0xff] %v1369_v48  ;;  %v1338_v51 = vmax.f32 %v1274_v49, 0.0  ;;  %v1370_v52 = vmax.f32 %v1306_v50, 0.0 }
 0x193   :  { %v813_v53 = vpop.f32.mrb[44].mxu0  ;;  %v941_v54 = vpop.f32.mrb[44].mxu1 }
 0x194   :  { %1402 = vst [vmem:[#allocation8 + $0xa8] sm:$0xff] %v1338_v51  ;;  %1434 = vst [vmem:[#allocation8 + $0x1a8] sm:$0xff] %v1370_v52  ;;  %v1204_v55 = vmul.f32 %v1864_v17, %v813_v53  ;;  %v1236_v56 = vmul.f32 %v1864_v17, %v941_v54  ;;  %v815_v57 = vpop.f32.mrb[45].mxu0  ;;  %v943_v58 = vpop.f32.mrb[45].mxu1 }
 0x195   :  { %v816_v59 = vpop.f32.mrb[46].mxu0  ;;  %v944_v60 = vpop.f32.mrb[46].mxu1 }
 0x196   :  { %v1275_v61 = vadd.f32 %v1869_v19, %v1204_v55  ;;  %v1307_v62 = vadd.f32 %v1869_v19, %v1236_v56  ;;  %v1205_v63 = vmul.f32 %v1864_v17, %v816_v59  ;;  %v1237_v0 = vmul.f32 %v1864_v17, %v944_v60  ;;  %v818_v1 = vpop.f32.mrb[47].mxu0  ;;  %v946_v2 = vpop.f32.mrb[47].mxu1 }
 0x198   :  { %v1339_v3 = vmax.f32 %v1275_v61, 0.0  ;;  %v1371_v4 = vmax.f32 %v1307_v62, 0.0  ;;  %v1276_v5 = vadd.f32 %v1869_v19, %v1205_v63  ;;  %v1308_v6 = vadd.f32 %v1869_v19, %v1237_v0 }
 0x19a   :  { %1403 = vst [vmem:[#allocation8 + $0xb0] sm:$0xff] %v1339_v3  ;;  %1435 = vst [vmem:[#allocation8 + $0x1b0] sm:$0xff] %v1371_v4  ;;  %v1340_v7 = vmax.f32 %v1276_v5, 0.0  ;;  %v1372_v8 = vmax.f32 %v1308_v6, 0.0 }
 0x19b   :  { %v821_v9 = vpop.f32.mrb[48].mxu0  ;;  %v949_v10 = vpop.f32.mrb[48].mxu1 }
 0x19c   :  { %1404 = vst [vmem:[#allocation8 + $0xb8] sm:$0xff] %v1340_v7  ;;  %1436 = vst [vmem:[#allocation8 + $0x1b8] sm:$0xff] %v1372_v8  ;;  %v1206_v11 = vmul.f32 %v1864_v17, %v821_v9  ;;  %v1238_v12 = vmul.f32 %v1864_v17, %v949_v10  ;;  %v823_v13 = vpop.f32.mrb[49].mxu0  ;;  %v951_v14 = vpop.f32.mrb[49].mxu1 }
 0x19d   :  { %v824_v15 = vpop.f32.mrb[50].mxu0  ;;  %v952_v16 = vpop.f32.mrb[50].mxu1 }
 0x19e   :  { %v1277_v18 = vadd.f32 %v1869_v19, %v1206_v11  ;;  %v1309_v20 = vadd.f32 %v1869_v19, %v1238_v12  ;;  %v1207_v21 = vmul.f32 %v1864_v17, %v824_v15  ;;  %v1239_v22 = vmul.f32 %v1864_v17, %v952_v16  ;;  %v826_v23 = vpop.f32.mrb[51].mxu0  ;;  %v954_v24 = vpop.f32.mrb[51].mxu1 }
 0x1a0   :  { %v1341_v25 = vmax.f32 %v1277_v18, 0.0  ;;  %v1373_v26 = vmax.f32 %v1309_v20, 0.0  ;;  %v1278_v27 = vadd.f32 %v1869_v19, %v1207_v21  ;;  %v1310_v28 = vadd.f32 %v1869_v19, %v1239_v22 }
 0x1a2   :  { %1405 = vst [vmem:[#allocation8 + $0xc0] sm:$0xff] %v1341_v25  ;;  %1437 = vst [vmem:[#allocation8 + $0x1c0] sm:$0xff] %v1373_v26  ;;  %v1342_v29 = vmax.f32 %v1278_v27, 0.0  ;;  %v1374_v30 = vmax.f32 %v1310_v28, 0.0 }
 0x1a3   :  { %v829_v31 = vpop.f32.mrb[52].mxu0  ;;  %v957_v32 = vpop.f32.mrb[52].mxu1 }
 0x1a4   :  { %1406 = vst [vmem:[#allocation8 + $0xc8] sm:$0xff] %v1342_v29  ;;  %1438 = vst [vmem:[#allocation8 + $0x1c8] sm:$0xff] %v1374_v30  ;;  %v1208_v33 = vmul.f32 %v1864_v17, %v829_v31  ;;  %v1240_v34 = vmul.f32 %v1864_v17, %v957_v32  ;;  %v831_v35 = vpop.f32.mrb[53].mxu0  ;;  %v959_v36 = vpop.f32.mrb[53].mxu1 }
 0x1a5   :  { %v832_v37 = vpop.f32.mrb[54].mxu0  ;;  %v960_v38 = vpop.f32.mrb[54].mxu1 }
 0x1a6   :  { %v1279_v39 = vadd.f32 %v1869_v19, %v1208_v33  ;;  %v1311_v40 = vadd.f32 %v1869_v19, %v1240_v34  ;;  %v1209_v41 = vmul.f32 %v1864_v17, %v832_v37  ;;  %v1241_v42 = vmul.f32 %v1864_v17, %v960_v38  ;;  %v834_v43 = vpop.f32.mrb[55].mxu0  ;;  %v962_v44 = vpop.f32.mrb[55].mxu1 }
 0x1a8   :  { %v1343_v45 = vmax.f32 %v1279_v39, 0.0  ;;  %v1375_v46 = vmax.f32 %v1311_v40, 0.0  ;;  %v1280_v47 = vadd.f32 %v1869_v19, %v1209_v41  ;;  %v1312_v48 = vadd.f32 %v1869_v19, %v1241_v42 }
 0x1aa   :  { %1407 = vst [vmem:[#allocation8 + $0xd0] sm:$0xff] %v1343_v45  ;;  %1439 = vst [vmem:[#allocation8 + $0x1d0] sm:$0xff] %v1375_v46  ;;  %v1344_v49 = vmax.f32 %v1280_v47, 0.0  ;;  %v1376_v50 = vmax.f32 %v1312_v48, 0.0 }
 0x1ab   :  { %v837_v51 = vpop.f32.mrb[56].mxu0  ;;  %v965_v52 = vpop.f32.mrb[56].mxu1 }
 0x1ac   :  { %1408 = vst [vmem:[#allocation8 + $0xd8] sm:$0xff] %v1344_v49  ;;  %1440 = vst [vmem:[#allocation8 + $0x1d8] sm:$0xff] %v1376_v50  ;;  %v1210_v53 = vmul.f32 %v1864_v17, %v837_v51  ;;  %v1242_v54 = vmul.f32 %v1864_v17, %v965_v52  ;;  %v839_v55 = vpop.f32.mrb[57].mxu0  ;;  %v967_v56 = vpop.f32.mrb[57].mxu1 }
 0x1ad   :  { %v840_v57 = vpop.f32.mrb[58].mxu0  ;;  %v968_v58 = vpop.f32.mrb[58].mxu1 }
 0x1ae   :  { %v1281_v59 = vadd.f32 %v1869_v19, %v1210_v53  ;;  %v1313_v60 = vadd.f32 %v1869_v19, %v1242_v54  ;;  %v1211_v61 = vmul.f32 %v1864_v17, %v840_v57  ;;  %v1243_v62 = vmul.f32 %v1864_v17, %v968_v58  ;;  %v842_v63 = vpop.f32.mrb[59].mxu0  ;;  %v970_v0 = vpop.f32.mrb[59].mxu1 }
 0x1b0   :  { %v1345_v1 = vmax.f32 %v1281_v59, 0.0  ;;  %v1377_v2 = vmax.f32 %v1313_v60, 0.0  ;;  %v1282_v3 = vadd.f32 %v1869_v19, %v1211_v61  ;;  %v1314_v4 = vadd.f32 %v1869_v19, %v1243_v62 }
 0x1b2   :  { %1409 = vst [vmem:[#allocation8 + $0xe0] sm:$0xff] %v1345_v1  ;;  %1441 = vst [vmem:[#allocation8 + $0x1e0] sm:$0xff] %v1377_v2  ;;  %v1346_v5 = vmax.f32 %v1282_v3, 0.0  ;;  %v1378_v6 = vmax.f32 %v1314_v4, 0.0 }
 0x1b3   :  { %v845_v7 = vpop.f32.mrb[60].mxu0  ;;  %v973_v8 = vpop.f32.mrb[60].mxu1 }
 0x1b4   :  { %1410 = vst [vmem:[#allocation8 + $0xe8] sm:$0xff] %v1346_v5  ;;  %1442 = vst [vmem:[#allocation8 + $0x1e8] sm:$0xff] %v1378_v6  ;;  %v1212_v9 = vmul.f32 %v1864_v17, %v845_v7  ;;  %v1244_v10 = vmul.f32 %v1864_v17, %v973_v8  ;;  %v847_v11 = vpop.f32.mrb[61].mxu0  ;;  %v975_v12 = vpop.f32.mrb[61].mxu1 }
 0x1b5   :  { %v848_v13 = vpop.f32.mrb[62].mxu0  ;;  %v976_v14 = vpop.f32.mrb[62].mxu1 }
 0x1b6   :  { %v1283_v15 = vadd.f32 %v1869_v19, %v1212_v9  ;;  %v1315_v16 = vadd.f32 %v1869_v19, %v1244_v10  ;;  %v1213_v18 = vmul.f32 %v1864_v17, %v848_v13  ;;  %v1245_v20 = vmul.f32 %v1864_v17, %v976_v14  ;;  %v850_v21 = vpop.f32.mrb[63].mxu0  ;;  %v978_v22 = vpop.f32.mrb[63].mxu1 }
 0x1b8   :  { %v1347_v23 = vmax.f32 %v1283_v15, 0.0  ;;  %v1379_v24 = vmax.f32 %v1315_v16, 0.0  ;;  %v1284_v25 = vadd.f32 %v1869_v19, %v1213_v18  ;;  %v1316_v26 = vadd.f32 %v1869_v19, %v1245_v20 }
 0x1ba   :  { %1411 = vst [vmem:[#allocation8 + $0xf0] sm:$0xff] %v1347_v23  ;;  %1443 = vst [vmem:[#allocation8 + $0x1f0] sm:$0xff] %v1379_v24  ;;  %v1348_v27 = vmax.f32 %v1284_v25, 0.0  ;;  %v1380_v28 = vmax.f32 %v1316_v26, 0.0 }
 0x1bc   :  { %1412 = vst [vmem:[#allocation8 + $0xf8] sm:$0xff] %v1348_v27  ;;  %1444 = vst [vmem:[#allocation8 + $0x1f8] sm:$0xff] %v1380_v28 }
 0x1bd   :  { %1752 = shalt.err (!%p1749_p6)
}
 0x1be   :  { %s1753_s22 = scalar_lea.hbm %s2018_s4, 8192 }
 0x1bf   :  { %p1754_p7 = scmp.ne.s32.totalorder %s2018_s4, %s1753_s22  ;;  %p1757_p8 = scmp.lt.u32.totalorder %s1753_s22, %s2018_s4 }
 0x1c1   :  { %p1759_p9 = pnand %p1757_p8, %p1754_p7 }
 0x1c3   :  { %1762 = shalt.err (!%p1759_p9)
}
 0x1c4   :  { %1456 = dma.vmem_to_hbm [thread:$0]  %s1451_s3, 8192, %s2018_s4, [#allocation5], %s1770_s25, %s1770_s25, %s1771_s26  }
 0x1c5   :  { %1767 = dma.done.wait [#allocation5], 8192  }
 0x1c6   :  { %1768 = vsyncadd [#allocation5], 4294959104 }
 0x1c7   :  { %1460 = vsyncpa [#allocation4], 1 }
 0x1c8   :  { %1461 = vsyncpa [#allocation7], 1 }
 0x1c9   :  { %1462 = vsyncpa [#allocation5], 1 }

</bundles_post_ra>
